<compile_context>
chip_gen: v6e
topology: v6e:2x2x1
jax: 0.10.0
libtpu: 0.0.40
codegen_flags: <defaults>
</compile_context>

<pallas_src>
import numpy as np
import jax
import jax.numpy as jnp
from jax.experimental import pallas as pl
from jax.experimental.pallas import tpu as pltpu

# ---------------- model hyper-parameters ----------------
N_NODES = 16
NUM_FEATURES = 8
HIDDEN = 32
NUM_CLASSES = 2
NUM_LAYERS = 2           # -> conv1 + convlast, no middle convs / bns
BN_EPS = 1e-5
PAD_N = 128              # node axis zero-padded to one full lane-vreg
NN = N_NODES * N_NODES

_LOG2N = N_NODES.bit_length() - 1
assert (1 << _LOG2N) == N_NODES, "N_NODES must be a power of two"

# ---- packed parameter slab layout (8-row-aligned offsets, 32 lanes wide) ----
_R_W1A = 0      # (H, F)  = w1a^T
_R_W1B = 32     # (H, H)  = w1b^T
_R_W2A = 64     # (H, H)  = w2a^T
_R_W2B = 96     # (F, H)  = w2b^T
_R_W5 = 104     # (H, F)  = w5^T
_R_COL = 136    # (H, 6)  columns: b1a, b1b, b2a, b5, gamma5*w6diff, b2b(pad)
_SLAB_ROWS = 168
_SLAB_COLS = 32


def ramsey_kernel(xt_ref, w_ref, s_ref, out_ref):
    # xt_ref : (F, PAD_N) node features, feature-major, zero past lane N_NODES
    # w_ref  : (168, 32)  packed parameter slab (see _R_* offsets)
    # s_ref  : (3,) SMEM  [eps1, eps2, bconst] (bconst = sum(beta5*w6diff)+b6diff)
    # out_ref: (C, N*N)   class-major edge probabilities (lane-dense 2x256)
    f32 = jnp.float32
    xt = xt_ref[...]                                            # (F, 128)
    eps1 = s_ref[0]
    eps2 = s_ref[1]
    bconst = s_ref[2]

    def relu(z):
        return jnp.maximum(z, 0.0)

    def leaky(z):                                               # slope 0.01 in (0,1)
        return jnp.maximum(z, 0.01 * z)

    def prefix_incl(a):
        # Inclusive prefix sum along lanes (Hillis-Steele, 4 XLU rolls).
        # Lanes >= N_NODES of `a` must be zero so the circular wrap-around
        # (reads from lanes >= 113) contributes nothing.
        for s in (1, 2, 4, 8):
            a = a + pltpu.roll(a, shift=s, axis=1)
        return a

    # --- static views into the packed slab (single DMA'd input) ---
    w1a_t = w_ref[_R_W1A:_R_W1A + HIDDEN, 0:NUM_FEATURES]      # (H, F)
    w1b_t = w_ref[_R_W1B:_R_W1B + HIDDEN, 0:HIDDEN]            # (H, H)
    w2a_t = w_ref[_R_W2A:_R_W2A + HIDDEN, 0:HIDDEN]            # (H, H)
    w2b_t = w_ref[_R_W2B:_R_W2B + NUM_FEATURES, 0:HIDDEN]      # (F, H)
    w5_t = w_ref[_R_W5:_R_W5 + HIDDEN, 0:NUM_FEATURES]         # (H, F)
    b1a = w_ref[_R_COL:_R_COL + HIDDEN, 0:1]                   # (H, 1)
    b1b = w_ref[_R_COL:_R_COL + HIDDEN, 1:2]
    b2a = w_ref[_R_COL:_R_COL + HIDDEN, 2:3]
    b5 = w_ref[_R_COL:_R_COL + HIDDEN, 3:4]
    gw = w_ref[_R_COL:_R_COL + HIDDEN, 4:5]                    # gamma5*(w6[:,1]-w6[:,0])
    b2b = w_ref[_R_COL:_R_COL + NUM_FEATURES, 5:6]             # (F, 1)

    # -------- GIN conv1 : MLP1((1+eps1)*x + sum_{src<dst} x_src) --------
    # Directed aggregation == exclusive prefix sum along node lanes; the
    # (1+eps)*x term is folded in: incl_prefix + eps*x.  No MXU round trip.
    h = prefix_incl(xt) + eps1 * xt                             # (F, 128)
    h = relu(jnp.dot(w1a_t, h, preferred_element_type=f32) + b1a)
    h = relu(jnp.dot(w1b_t, h, preferred_element_type=f32) + b1b)
    x1 = leaky(h)                                               # (H, 128)
    # Zero the padding lanes (bias / scan spill) before the second scan.
    lane = jax.lax.broadcasted_iota(jnp.int32, (HIDDEN, PAD_N), 1)
    x1 = jnp.where(lane < N_NODES, x1, 0.0)

    # -------- GIN convlast : MLP2((1+eps2)*x + aggr), residual with xinit ----
    h2 = prefix_incl(x1) + eps2 * x1
    h2 = relu(jnp.dot(w2a_t, h2, preferred_element_type=f32) + b2a)
    h2 = relu(jnp.dot(w2b_t, h2, preferred_element_type=f32) + b2b)   # (F, 128)
    x2 = (h2 + xt)[:, 0:N_NODES]                                # (F, N) valid lanes

    # -------- EdgePredNet over all N*N ordered pairs (fused i/j gather) -----
    # Pair k = i*N + j; one (N, 2*N*N) selection matrix built on-chip, one dot.
    kcol = jax.lax.broadcasted_iota(jnp.int32, (N_NODES, 2 * NN), 1)
    nrow = jax.lax.broadcasted_iota(jnp.int32, (N_NODES, 2 * NN), 0)
    tgt = jnp.where(kcol < NN, kcol >> _LOG2N, kcol & (N_NODES - 1))
    sel = (tgt == nrow).astype(f32)                             # (N, 2*N*N)
    xij = jnp.dot(x2, sel, preferred_element_type=f32)          # (F, 2*N*N)
    xi = xij[:, 0:NN]                                           # lane-aligned slices
    xj = xij[:, NN:2 * NN]

    e = leaky(jnp.dot(w5_t, xi * xj, preferred_element_type=f32) + b5)  # (H, N*N)

    # BatchNorm1d (train mode, biased var) stats over off-diagonal pairs only:
    # 240 pairs = the 120 true edges counted twice -> identical batch stats.
    # Single pass: mean and E[x^2] reduced together, var = E[x^2] - mean^2.
    kk = jax.lax.broadcasted_iota(jnp.int32, (1, NN), 1)
    offdiag = ((kk >> _LOG2N) != (kk & (N_NODES - 1))).astype(f32)      # (1, N*N)
    inv_cnt = 1.0 / float(NN - N_NODES)
    em = e * offdiag
    mean = jnp.sum(em, axis=1, keepdims=True) * inv_cnt                 # (H, 1)
    ex2 = jnp.sum(em * e, axis=1, keepdims=True) * inv_cnt              # (H, 1)
    var = ex2 - mean * mean

    # BN affine + lin6 folded: d = sum_h e*scale - sum_h mean*scale + bconst,
    # with scale = gamma5 * w6diff * rsqrt(var+eps).  No (H, N*N) normalized
    # tensor is materialized.
    scale = gw * jax.lax.rsqrt(var + BN_EPS)                            # (H, 1)
    d = (jnp.sum(e * scale, axis=0, keepdims=True)
         - jnp.sum(mean * scale, axis=0, keepdims=True) + bconst)       # (1, N*N)

    # 2-class softmax: p0 = sigmoid(-d), p1 = sigmoid(d); diagonal forced to 0.
    row = jax.lax.broadcasted_iota(jnp.int32, (NUM_CLASSES, NN), 0)
    db = jnp.where(row == 0, -d, d)                                     # (C, N*N)
    out_ref[...] = offdiag * (1.0 / (1.0 + jnp.exp(-db)))               # single store


def init_params(key):
    """Deterministic parameter init (matches PyTorch default shapes)."""
    ks = jax.random.split(key, 8)

    def lin_init(k, fan_in, fan_out):
        kw, kb = jax.random.split(k)
        bound = 1.0 / np.sqrt(fan_in)
        w = jax.random.uniform(kw, (fan_in, fan_out), jnp.float32, -bound, bound)
        b = jax.random.uniform(kb, (1, fan_out), jnp.float32, -bound, bound)
        return w, b

    node_features = jax.random.uniform(ks[0], (N_NODES, NUM_FEATURES),
                                       jnp.float32)          # torch.rand
    # conv1 MLP: Linear(F->H), ReLU, Linear(H->H), ReLU
    w1a, b1a = lin_init(ks[1], NUM_FEATURES, HIDDEN)
    w1b, b1b = lin_init(ks[2], HIDDEN, HIDDEN)
    # convlast MLP: Linear(H->H), ReLU, Linear(H->F), ReLU
    w2a, b2a = lin_init(ks[3], HIDDEN, HIDDEN)
    w2b, b2b = lin_init(ks[4], HIDDEN, NUM_FEATURES)
    # EdgePredNet
    w5, b5 = lin_init(ks[5], NUM_FEATURES, HIDDEN)
    gamma5 = jnp.ones((1, HIDDEN), jnp.float32)
    beta5 = jnp.zeros((1, HIDDEN), jnp.float32)
    w6, b6 = lin_init(ks[6], HIDDEN, NUM_CLASSES)
    # GIN eps (train_eps=True, init 0.0) for conv1 and convlast
    eps = jnp.zeros((2,), jnp.float32)
    return dict(node_features=node_features,
                w1a=w1a, b1a=b1a, w1b=w1b, b1b=b1b,
                w2a=w2a, b2a=b2a, w2b=w2b, b2b=b2b,
                w5=w5, b5=b5, gamma5=gamma5, beta5=beta5,
                w6=w6, b6=b6, eps=eps)


def prepare_params(params):
    """One-time packing, hoisted out of the jitted hot path.

    Returns (xt_padded, slab, scalars): the padded feature-major node features,
    the (168, 32) weight slab and the 3 SMEM scalars.  Re-run only when the
    weights change; the hot path is then just {pallas_call + output reshape}.
    """
    def blk(a, nrows):
        rr, cc = a.shape
        return jnp.pad(a.astype(jnp.float32),
                       ((0, nrows - rr), (0, _SLAB_COLS - cc)))

    w6d = (params["w6"][:, 1] - params["w6"][:, 0])[:, None]              # (H, 1)
    gw = params["gamma5"].T * w6d                                         # (H, 1)
    b2b_col = jnp.pad(params["b2b"].T, ((0, HIDDEN - NUM_FEATURES), (0, 0)))
    colpack = jnp.concatenate(
        [params["b1a"].T, params["b1b"].T, params["b2a"].T, params["b5"].T,
         gw, b2b_col], axis=1)                                            # (H, 6)
    slab = jnp.concatenate([
        blk(params["w1a"].T, 32),     # rows   0: 32  (H, F)
        blk(params["w1b"].T, 32),     # rows  32: 64  (H, H)
        blk(params["w2a"].T, 32),     # rows  64: 96  (H, H)
        blk(params["w2b"].T, 8),      # rows  96:104  (F, H)
        blk(params["w5"].T, 32),      # rows 104:136  (H, F)
        blk(colpack, 32),             # rows 136:168  (H, 6)
    ], axis=0)                                                            # (168, 32)
    bconst = (jnp.sum(params["beta5"][0] * w6d[:, 0])
              + (params["b6"][0, 1] - params["b6"][0, 0]))
    scalars = jnp.stack([params["eps"][0], params["eps"][1],
                         bconst]).astype(jnp.float32)                     # (3,)
    xt_pad = jnp.pad(params["node_features"].T.astype(jnp.float32),
                     ((0, 0), (0, PAD_N - N_NODES)))                      # (F, 128)
    return xt_pad, slab, scalars


@jax.jit
def ramsey_mpnn_forward(xt_pad, slab, scalars):
    """Hot path: one pallas_call plus the output layout reshape."""
    vmem = pl.BlockSpec(memory_space=pltpu.MemorySpace.VMEM)
    smem = pl.BlockSpec(memory_space=pltpu.MemorySpace.SMEM)
    out = pl.pallas_call(
        ramsey_kernel,
        out_shape=jax.ShapeDtypeStruct((NUM_CLASSES, NN), jnp.float32),
        in_specs=[vmem, vmem, smem],
        out_specs=vmem,
    )(xt_pad, slab, scalars)
    # (C, N*N) -> (N, N, C): pure layout plumbing in the wrapper.
    return out.T.reshape(N_NODES, N_NODES, NUM_CLASSES)

# TODO(synk): if this forward is evaluated for many graphs per step (search/RL
# loop), stack graphs along the node/lane axis and add a "parallel" grid axis
# so the MXU fills and both v7x TensorCores are used; single-graph semantics
# of the original module are kept here.


def reference_forward(params):
    """Pure-JAX reference of ramsey_MPNN.forward (train-mode BN, GIN, softmax)."""
    def relu(z):
        return jnp.maximum(z, 0.0)

    def leaky(z):
        return jnp.where(z >= 0, z, 0.01 * z)

    x0 = params["node_features"]
    n = N_NODES
    rr = jnp.arange(n)[:, None]
    cc = jnp.arange(n)[None, :]
    L = (cc < rr).astype(jnp.float32)            # L[dst, src] = 1 iff src < dst
    eps1, eps2 = params["eps"][0], params["eps"][1]
    h = (1.0 + eps1) * x0 + L @ x0
    h = relu(h @ params["w1a"] + params["b1a"])
    h = relu(h @ params["w1b"] + params["b1b"])
    x1 = leaky(h)
    h2 = (1.0 + eps2) * x1 + L @ x1
    h2 = relu(h2 @ params["w2a"] + params["b2a"])
    h2 = relu(h2 @ params["w2b"] + params["b2b"])
    x2 = h2 + x0
    rows, cols = np.triu_indices(n, k=1)
    xi = x2[rows]
    xj = x2[cols]
    e = leaky((xi * xj) @ params["w5"] + params["b5"])
    mean = jnp.mean(e, axis=0, keepdims=True)
    var = jnp.mean(jnp.square(e - mean), axis=0, keepdims=True)
    e = (e - mean) * jax.lax.rsqrt(var + BN_EPS) * params["gamma5"] + params["beta5"]
    e = e @ params["w6"] + params["b6"]
    sm = jax.nn.softmax(e, axis=-1)
    probs = jnp.zeros((n, n, NUM_CLASSES), jnp.float32)
    probs = probs.at[rows, cols].set(sm).at[cols, rows].set(sm)
    return probs


if __name__ == "__main__":
    key = jax.random.PRNGKey(0)
    params = init_params(key)
    # Packing / transposes run once here, outside the jitted hot path.
    xt_pad, slab, scalars = prepare_params(params)
    probs = ramsey_mpnn_forward(xt_pad, slab, scalars)
    probs = jax.block_until_ready(probs)
    assert probs.shape == (N_NODES, N_NODES, NUM_CLASSES)
    assert bool(jnp.all(jnp.isfinite(probs)))
    ref = reference_forward(params)
    np.testing.assert_allclose(np.asarray(probs), np.asarray(ref),
                               rtol=1e-3, atol=1e-4)
    print("KERNEL_OK")
</pallas_src>

<mosaic_0001>
module attributes {stable_mosaic.version = 11 : i64} {
  func.func @ramsey_kernel(%arg0: memref<8x128xf32, #tpu.memory_space<vmem>>, %arg1: memref<168x32xf32, #tpu.memory_space<vmem>>, %arg2: memref<3xf32, #tpu.memory_space<smem>>, %arg3: memref<2x256xf32, #tpu.memory_space<vmem>>) attributes {dimension_semantics = [], scalar_prefetch = 0 : i64, scratch_operands = 0 : i64, tpu.core_type = #tpu.core_type<tc>} {
    %c0 = arith.constant 0 : index
    %c0_0 = arith.constant 0 : index
    %0 = vector.load %arg0[%c0, %c0_0] : memref<8x128xf32, #tpu.memory_space<vmem>>, vector<8x128xf32>
    %c0_1 = arith.constant 0 : index
    %1 = memref.load %arg2[%c0_1] : memref<3xf32, #tpu.memory_space<smem>>
    %c1 = arith.constant 1 : index
    %2 = memref.load %arg2[%c1] : memref<3xf32, #tpu.memory_space<smem>>
    %c2 = arith.constant 2 : index
    %3 = memref.load %arg2[%c2] : memref<3xf32, #tpu.memory_space<smem>>
    %c0_2 = arith.constant 0 : index
    %c0_3 = arith.constant 0 : index
    %4 = vector.load %arg1[%c0_2, %c0_3] : memref<168x32xf32, #tpu.memory_space<vmem>>, vector<32x8xf32>
    %c32 = arith.constant 32 : index
    %c0_4 = arith.constant 0 : index
    %5 = vector.load %arg1[%c32, %c0_4] : memref<168x32xf32, #tpu.memory_space<vmem>>, vector<32x32xf32>
    %c64 = arith.constant 64 : index
    %c0_5 = arith.constant 0 : index
    %6 = vector.load %arg1[%c64, %c0_5] : memref<168x32xf32, #tpu.memory_space<vmem>>, vector<32x32xf32>
    %c96 = arith.constant 96 : index
    %c0_6 = arith.constant 0 : index
    %7 = vector.load %arg1[%c96, %c0_6] : memref<168x32xf32, #tpu.memory_space<vmem>>, vector<8x32xf32>
    %c104 = arith.constant 104 : index
    %c0_7 = arith.constant 0 : index
    %8 = vector.load %arg1[%c104, %c0_7] : memref<168x32xf32, #tpu.memory_space<vmem>>, vector<32x8xf32>
    %c136 = arith.constant 136 : index
    %c0_8 = arith.constant 0 : index
    %9 = vector.load %arg1[%c136, %c0_8] : memref<168x32xf32, #tpu.memory_space<vmem>>, vector<32x1xf32>
    %c136_9 = arith.constant 136 : index
    %c1_10 = arith.constant 1 : index
    %10 = vector.load %arg1[%c136_9, %c1_10] : memref<168x32xf32, #tpu.memory_space<vmem>>, vector<32x1xf32>
    %c136_11 = arith.constant 136 : index
    %c2_12 = arith.constant 2 : index
    %11 = vector.load %arg1[%c136_11, %c2_12] : memref<168x32xf32, #tpu.memory_space<vmem>>, vector<32x1xf32>
    %c136_13 = arith.constant 136 : index
    %c3 = arith.constant 3 : index
    %12 = vector.load %arg1[%c136_13, %c3] : memref<168x32xf32, #tpu.memory_space<vmem>>, vector<32x1xf32>
    %c136_14 = arith.constant 136 : index
    %c4 = arith.constant 4 : index
    %13 = vector.load %arg1[%c136_14, %c4] : memref<168x32xf32, #tpu.memory_space<vmem>>, vector<32x1xf32>
    %c136_15 = arith.constant 136 : index
    %c5 = arith.constant 5 : index
    %14 = vector.load %arg1[%c136_15, %c5] : memref<168x32xf32, #tpu.memory_space<vmem>>, vector<8x1xf32>
    %c1_i32 = arith.constant 1 : i32
    %15 = tpu.dynamic_rotate %0 by %c1_i32 dim 1 : vector<8x128xf32>, i32 -> vector<8x128xf32>
    %16 = arith.addf %0, %15 : vector<8x128xf32>
    %c2_i32 = arith.constant 2 : i32
    %17 = tpu.dynamic_rotate %16 by %c2_i32 dim 1 : vector<8x128xf32>, i32 -> vector<8x128xf32>
    %18 = arith.addf %16, %17 : vector<8x128xf32>
    %c4_i32 = arith.constant 4 : i32
    %19 = tpu.dynamic_rotate %18 by %c4_i32 dim 1 : vector<8x128xf32>, i32 -> vector<8x128xf32>
    %20 = arith.addf %18, %19 : vector<8x128xf32>
    %c8_i32 = arith.constant 8 : i32
    %21 = tpu.dynamic_rotate %20 by %c8_i32 dim 1 : vector<8x128xf32>, i32 -> vector<8x128xf32>
    %22 = arith.addf %20, %21 : vector<8x128xf32>
    %23 = vector.broadcast %1 : f32 to vector<8x128xf32>
    %24 = arith.mulf %23, %0 : vector<8x128xf32>
    %25 = arith.addf %22, %24 : vector<8x128xf32>
    %cst = arith.constant dense<0.000000e+00> : vector<32x128xf32>
    %26 = tpu.matmul %4, %25, %cst {dimension_numbers = #tpu.dot_dimension_numbers<[1], [0], [0], [1], [0, 0, 1, 1], [], []>} : vector<32x8xf32>, vector<8x128xf32>, vector<32x128xf32> -> vector<32x128xf32>
    %27 = vector.broadcast %9 : vector<32x1xf32> to vector<32x128xf32>
    %28 = arith.addf %26, %27 : vector<32x128xf32>
    %cst_16 = arith.constant 0.000000e+00 : f32
    %29 = vector.broadcast %cst_16 : f32 to vector<32x128xf32>
    %30 = arith.maximumf %28, %29 : vector<32x128xf32>
    %cst_17 = arith.constant dense<0.000000e+00> : vector<32x128xf32>
    %31 = tpu.matmul %5, %30, %cst_17 {dimension_numbers = #tpu.dot_dimension_numbers<[1], [0], [0], [1], [0, 0, 1, 1], [], []>} : vector<32x32xf32>, vector<32x128xf32>, vector<32x128xf32> -> vector<32x128xf32>
    %32 = vector.broadcast %10 : vector<32x1xf32> to vector<32x128xf32>
    %33 = arith.addf %31, %32 : vector<32x128xf32>
    %cst_18 = arith.constant 0.000000e+00 : f32
    %34 = vector.broadcast %cst_18 : f32 to vector<32x128xf32>
    %35 = arith.maximumf %33, %34 : vector<32x128xf32>
    %cst_19 = arith.constant 0.00999999977 : f32
    %36 = vector.broadcast %cst_19 : f32 to vector<32x128xf32>
    %37 = arith.mulf %36, %35 : vector<32x128xf32>
    %38 = arith.maximumf %35, %37 : vector<32x128xf32>
    %39 = tpu.iota {dimensions = array<i32: 1>} : vector<32x128xi32>
    %c16_i32 = arith.constant 16 : i32
    %40 = vector.broadcast %c16_i32 : i32 to vector<32x128xi32>
    %41 = arith.cmpi slt, %39, %40 : vector<32x128xi32>
    %cst_20 = arith.constant 0.000000e+00 : f32
    %42 = vector.broadcast %cst_20 : f32 to vector<32x128xf32>
    %43 = arith.select %41, %38, %42 : vector<32x128xi1>, vector<32x128xf32>
    %c1_i32_21 = arith.constant 1 : i32
    %44 = tpu.dynamic_rotate %43 by %c1_i32_21 dim 1 : vector<32x128xf32>, i32 -> vector<32x128xf32>
    %45 = arith.addf %43, %44 : vector<32x128xf32>
    %c2_i32_22 = arith.constant 2 : i32
    %46 = tpu.dynamic_rotate %45 by %c2_i32_22 dim 1 : vector<32x128xf32>, i32 -> vector<32x128xf32>
    %47 = arith.addf %45, %46 : vector<32x128xf32>
    %c4_i32_23 = arith.constant 4 : i32
    %48 = tpu.dynamic_rotate %47 by %c4_i32_23 dim 1 : vector<32x128xf32>, i32 -> vector<32x128xf32>
    %49 = arith.addf %47, %48 : vector<32x128xf32>
    %c8_i32_24 = arith.constant 8 : i32
    %50 = tpu.dynamic_rotate %49 by %c8_i32_24 dim 1 : vector<32x128xf32>, i32 -> vector<32x128xf32>
    %51 = arith.addf %49, %50 : vector<32x128xf32>
    %52 = vector.broadcast %2 : f32 to vector<32x128xf32>
    %53 = arith.mulf %52, %43 : vector<32x128xf32>
    %54 = arith.addf %51, %53 : vector<32x128xf32>
    %cst_25 = arith.constant dense<0.000000e+00> : vector<32x128xf32>
    %55 = tpu.matmul %6, %54, %cst_25 {dimension_numbers = #tpu.dot_dimension_numbers<[1], [0], [0], [1], [0, 0, 1, 1], [], []>} : vector<32x32xf32>, vector<32x128xf32>, vector<32x128xf32> -> vector<32x128xf32>
    %56 = vector.broadcast %11 : vector<32x1xf32> to vector<32x128xf32>
    %57 = arith.addf %55, %56 : vector<32x128xf32>
    %cst_26 = arith.constant 0.000000e+00 : f32
    %58 = vector.broadcast %cst_26 : f32 to vector<32x128xf32>
    %59 = arith.maximumf %57, %58 : vector<32x128xf32>
    %cst_27 = arith.constant dense<0.000000e+00> : vector<8x128xf32>
    %60 = tpu.matmul %7, %59, %cst_27 {dimension_numbers = #tpu.dot_dimension_numbers<[1], [0], [0], [1], [0, 0, 1, 1], [], []>} : vector<8x32xf32>, vector<32x128xf32>, vector<8x128xf32> -> vector<8x128xf32>
    %61 = vector.broadcast %14 : vector<8x1xf32> to vector<8x128xf32>
    %62 = arith.addf %60, %61 : vector<8x128xf32>
    %cst_28 = arith.constant 0.000000e+00 : f32
    %63 = vector.broadcast %cst_28 : f32 to vector<8x128xf32>
    %64 = arith.maximumf %62, %63 : vector<8x128xf32>
    %65 = arith.addf %64, %0 : vector<8x128xf32>
    %66 = vector.extract_strided_slice %65 {offsets = [0, 0], sizes = [8, 16], strides = [1, 1]} : vector<8x128xf32> to vector<8x16xf32>
    %67 = tpu.iota {dimensions = array<i32: 1>} : vector<16x512xi32>
    %68 = tpu.iota {dimensions = array<i32: 0>} : vector<16x512xi32>
    %c256_i32 = arith.constant 256 : i32
    %69 = vector.broadcast %c256_i32 : i32 to vector<16x512xi32>
    %70 = arith.cmpi slt, %67, %69 : vector<16x512xi32>
    %c4_i32_29 = arith.constant 4 : i32
    %71 = vector.broadcast %c4_i32_29 : i32 to vector<16x512xi32>
    %72 = arith.shrsi %67, %71 : vector<16x512xi32>
    %c15_i32 = arith.constant 15 : i32
    %73 = vector.broadcast %c15_i32 : i32 to vector<16x512xi32>
    %74 = arith.andi %67, %73 : vector<16x512xi32>
    %75 = arith.select %70, %72, %74 : vector<16x512xi1>, vector<16x512xi32>
    %76 = arith.cmpi eq, %75, %68 : vector<16x512xi32>
    %77 = arith.extui %76 : vector<16x512xi1> to vector<16x512xi32>
    %78 = arith.sitofp %77 : vector<16x512xi32> to vector<16x512xf32>
    %cst_30 = arith.constant dense<0.000000e+00> : vector<8x512xf32>
    %79 = tpu.matmul %66, %78, %cst_30 {dimension_numbers = #tpu.dot_dimension_numbers<[1], [0], [0], [1], [0, 0, 1, 1], [], []>} : vector<8x16xf32>, vector<16x512xf32>, vector<8x512xf32> -> vector<8x512xf32>
    %80 = vector.extract_strided_slice %79 {offsets = [0, 0], sizes = [8, 256], strides = [1, 1]} : vector<8x512xf32> to vector<8x256xf32>
    %81 = vector.extract_strided_slice %79 {offsets = [0, 256], sizes = [8, 256], strides = [1, 1]} : vector<8x512xf32> to vector<8x256xf32>
    %82 = arith.mulf %80, %81 : vector<8x256xf32>
    %cst_31 = arith.constant dense<0.000000e+00> : vector<32x256xf32>
    %83 = tpu.matmul %8, %82, %cst_31 {dimension_numbers = #tpu.dot_dimension_numbers<[1], [0], [0], [1], [0, 0, 1, 1], [], []>} : vector<32x8xf32>, vector<8x256xf32>, vector<32x256xf32> -> vector<32x256xf32>
    %84 = vector.broadcast %12 : vector<32x1xf32> to vector<32x256xf32>
    %85 = arith.addf %83, %84 : vector<32x256xf32>
    %cst_32 = arith.constant 0.00999999977 : f32
    %86 = vector.broadcast %cst_32 : f32 to vector<32x256xf32>
    %87 = arith.mulf %86, %85 : vector<32x256xf32>
    %88 = arith.maximumf %85, %87 : vector<32x256xf32>
    %89 = tpu.iota {dimensions = array<i32: 1>} : vector<1x256xi32>
    %c4_i32_33 = arith.constant 4 : i32
    %90 = vector.broadcast %c4_i32_33 : i32 to vector<1x256xi32>
    %91 = arith.shrsi %89, %90 : vector<1x256xi32>
    %c15_i32_34 = arith.constant 15 : i32
    %92 = vector.broadcast %c15_i32_34 : i32 to vector<1x256xi32>
    %93 = arith.andi %89, %92 : vector<1x256xi32>
    %94 = arith.cmpi ne, %91, %93 : vector<1x256xi32>
    %95 = arith.extui %94 : vector<1x256xi1> to vector<1x256xi32>
    %96 = arith.sitofp %95 : vector<1x256xi32> to vector<1x256xf32>
    %97 = vector.broadcast %96 : vector<1x256xf32> to vector<32x256xf32>
    %98 = arith.mulf %88, %97 : vector<32x256xf32>
    %cst_35 = arith.constant dense<0.000000e+00> : vector<32xf32>
    %99 = vector.multi_reduction <add>, %98, %cst_35 [1] : vector<32x256xf32> to vector<32xf32>
    %100 = vector.shape_cast %99 : vector<32xf32> to vector<32x1xf32>
    %cst_36 = arith.constant 0.00416666688 : f32
    %101 = vector.broadcast %cst_36 : f32 to vector<32x1xf32>
    %102 = arith.mulf %100, %101 : vector<32x1xf32>
    %103 = arith.mulf %98, %88 : vector<32x256xf32>
    %cst_37 = arith.constant dense<0.000000e+00> : vector<32xf32>
    %104 = vector.multi_reduction <add>, %103, %cst_37 [1] : vector<32x256xf32> to vector<32xf32>
    %105 = vector.shape_cast %104 : vector<32xf32> to vector<32x1xf32>
    %cst_38 = arith.constant 0.00416666688 : f32
    %106 = vector.broadcast %cst_38 : f32 to vector<32x1xf32>
    %107 = arith.mulf %105, %106 : vector<32x1xf32>
    %108 = arith.mulf %102, %102 : vector<32x1xf32>
    %109 = arith.subf %107, %108 : vector<32x1xf32>
    %cst_39 = arith.constant 9.99999974E-6 : f32
    %110 = vector.broadcast %cst_39 : f32 to vector<32x1xf32>
    %111 = arith.addf %109, %110 : vector<32x1xf32>
    %112 = math.rsqrt %111 : vector<32x1xf32>
    %113 = arith.mulf %13, %112 : vector<32x1xf32>
    %114 = vector.broadcast %113 : vector<32x1xf32> to vector<32x256xf32>
    %115 = arith.mulf %88, %114 : vector<32x256xf32>
    %cst_40 = arith.constant dense<0.000000e+00> : vector<256xf32>
    %116 = vector.multi_reduction <add>, %115, %cst_40 [0] : vector<32x256xf32> to vector<256xf32>
    %117 = vector.shape_cast %116 : vector<256xf32> to vector<1x256xf32>
    %118 = arith.mulf %102, %113 : vector<32x1xf32>
    %cst_41 = arith.constant dense<0.000000e+00> : vector<1xf32>
    %119 = vector.multi_reduction <add>, %118, %cst_41 [0] : vector<32x1xf32> to vector<1xf32>
    %120 = vector.shape_cast %119 : vector<1xf32> to vector<1x1xf32>
    %121 = vector.broadcast %120 : vector<1x1xf32> to vector<1x256xf32>
    %122 = arith.subf %117, %121 : vector<1x256xf32>
    %123 = vector.broadcast %3 : f32 to vector<1x256xf32>
    %124 = arith.addf %122, %123 : vector<1x256xf32>
    %125 = tpu.iota {dimensions = array<i32: 0>} : vector<2x256xi32>
    %c0_i32 = arith.constant 0 : i32
    %126 = vector.broadcast %c0_i32 : i32 to vector<2x256xi32>
    %127 = arith.cmpi eq, %125, %126 : vector<2x256xi32>
    %cst_42 = arith.constant 0.000000e+00 : f32
    %128 = vector.broadcast %cst_42 : f32 to vector<1x256xf32>
    %129 = arith.subf %128, %124 : vector<1x256xf32>
    %130 = vector.shape_cast %129 : vector<1x256xf32> to vector<1x256xf32>
    %131 = vector.broadcast %130 : vector<1x256xf32> to vector<2x256xf32>
    %132 = vector.shape_cast %124 : vector<1x256xf32> to vector<1x256xf32>
    %133 = vector.broadcast %132 : vector<1x256xf32> to vector<2x256xf32>
    %134 = arith.select %127, %131, %133 : vector<2x256xi1>, vector<2x256xf32>
    %cst_43 = arith.constant 0.000000e+00 : f32
    %135 = vector.broadcast %cst_43 : f32 to vector<2x256xf32>
    %136 = arith.subf %135, %134 : vector<2x256xf32>
    %137 = math.exp %136 : vector<2x256xf32>
    %cst_44 = arith.constant 1.000000e+00 : f32
    %138 = vector.broadcast %cst_44 : f32 to vector<2x256xf32>
    %139 = arith.addf %138, %137 : vector<2x256xf32>
    %cst_45 = arith.constant 1.000000e+00 : f32
    %140 = vector.broadcast %cst_45 : f32 to vector<2x256xf32>
    %141 = arith.divf %140, %139 : vector<2x256xf32>
    %142 = vector.broadcast %96 : vector<1x256xf32> to vector<2x256xf32>
    %143 = arith.mulf %142, %141 : vector<2x256xf32>
    %c0_46 = arith.constant 0 : index
    %c0_47 = arith.constant 0 : index
    %144 = vector.load %arg3[%c0_46, %c0_47] : memref<2x256xf32, #tpu.memory_space<vmem>>, vector<2x256xf32>
    tpu.vector_store %arg3[%c0_46, %c0_47], %143 {strides = array<i32>} : memref<2x256xf32, #tpu.memory_space<vmem>>, vector<2x256xf32>,
    return
  }
}

</mosaic_0001>

<bundles_post_ra>
// kernel: ramsey_mpnn_forward.1
= control target key start
LH: loop header
LB: loop body
LE: loop exit
PB: predicated region body
PF: predicated region fallthrough
CT: control target
= control target key end

     0   :  { %8 = vsyncpa [#allocation3], 0  ;;  %s1531_s0 = inlined_call_operand.vmem [shape: f32[8,128], index: 0, kind: input, shape index: {}]   ;;  %s1532_s1 = inlined_call_operand.vmem [shape: f32[168,32], index: 1, kind: input, shape index: {}]   ;;  %s1533_s2 = inlined_call_operand.vmem [shape: f32[3], index: 2, kind: input, shape index: {}]   ;;  %s1534_s3 = inlined_call_operand.vmem [shape: f32[2,256], index: 3, kind: output, shape index: {}]  }
   0x1   :  { %s19_s14 = sshll.u32 %s1533_s2, 4  ;;  %s20_s14 = int_to_ptr.vmem [resolvable:$true] %s19_s14 }
   0x2   :  { %s1240_s15 = scalar_lea.vmem %s20_s14, 16  ;;  %p1245_p1 = scmp.lt.s32.totalorder %s20_s14, %s20_s14 }
   0x3   :  { %p1241_p0 = scmp.ne.s32.totalorder %s20_s14, %s1240_s15  ;;  %p1246_p2 = scmp.lt.s32.totalorder %s1240_s15, %s1240_s15 }
   0x5   :  { %p1247_p3 = por %p1246_p2, %p1245_p1 }
   0x7   :  { %p1248_p4 = pnand %p1247_p3, %p1241_p0 }
   0x9   :  { %1251 = shalt.err (!%p1248_p4)
}
   0xa   :  { %s1254_s16 = smov [#allocation2]  }
   0xb   :  { %22 = dma.vmem_to_smem %s20_s14, 16, %s1254_s16, [#allocation3]  }
   0xc   :  { %1252 = dma.done.wait [#allocation3], 16  }
   0xd   :  { %1253 = vsyncadd [#allocation3], 4294967280 }
   0xe   :  { %26 = sfence }
   0xf   :  { %v1294_v0 = vld [vmem:[%s1531_s0] sm:$0xff]  ;;  %s1255_s19 = smov 1   ;;  %s1256_s2 = smov 2   ;;  %vm87_vm0 = vcmask 64512   ;;  %v1258_v9 = vmov 0   ;;  %v1315_v10 = vld [vmem:[%s1532_s1 + $0x88] sm:$0xff]  ;;  %v315_v51 = vlaneseq }
  0x10   :  { %52 = vrot.lane.b32.xlu0 %v1294_v0, %s1255_s19  ;;  %s1257_s20 = smov 4   ;;  %v31_v5 = vld [vmem:[%s1532_s1] sm:$0xff]  ;;  %1214 = vset.pattern.permute.xlu1 %v1258_v9  ;;  %s1259_s24 = smov 8   ;;  %v1320_v11 = vld [vmem:[%s1532_s1 + $0x98] sm:$0xff]  ;;  %v1327_v12 = vld [vmem:[%s1532_s1 + $0x90] sm:$0xff]  ;;  %vm205_vm1 = vcmask 261120  }
  0x11   :  { %1154 = vmatprep.mubr.msk.f32.mxu0 %vm87_vm0, %v31_v5  ;;  %v1308_v7 = vld [vmem:[%s1532_s1 + $0xa0] sm:$0xff]  ;;  %1213 = vset.pattern.permute.xlu0 %v1258_v9  ;;  %s28_s4 = sld [smem:[#allocation2]]  ;;  %v32_v18 = vld [vmem:[%s1532_s1 + $0x8] sm:$0xff]  ;;  %v33_v19 = vld [vmem:[%s1532_s1 + $0x10] sm:$0xff]  ;;  %v1260_v22 = vmov 1   ;;  %v1364_v58 = vand.u32 127, %v315_v51 }
  0x12   :  { %v34_v20 = vld [vmem:[%s1532_s1 + $0x18] sm:$0xff]  ;;  %v35_v21 = vld [vmem:[%s1532_s1 + $0x20] sm:$0xff]  ;;  %v36_v39 = vld [vmem:[%s1532_s1 + $0x28] sm:$0xff]  ;;  %vm1263_vm3 = vmmov 0   ;;  %vm621_vm12 = vcmask 130048   ;;  %vm1026_vm15 = vcmask 39968  }
  0x13   :  { %1168 = vmatprep.mubr.msk.f32.mxu1 %vm205_vm1, %v35_v21  ;;  %v37_v40 = vld [vmem:[%s1532_s1 + $0x30] sm:$0xff]  ;;  %v38_v41 = vld [vmem:[%s1532_s1 + $0x38] sm:$0xff]  ;;  %vm317_vm2 = vcmp.lt.s32.totalorder %v1364_v58, 16 }
  0x17   :  { %v64_v13 = vstv %s28_s4 }
  0x18   :  { %v65_v14 = vmul.f32 %v64_v13, %v1294_v0 }
  0x82   :  { %v53_v1 = vpop.permute.xlu0 %52 }
  0x83   :  { %v54_v2 = vadd.f32 %v53_v1, %v1294_v0 }
  0x85   :  { %55 = vrot.lane.b32.xlu0 %v54_v2, %s1256_s2 }
  0x89   :  { %84 = vperm.xlu0 %1213, %v1308_v7  }
  0x8d   :  { %69 = vperm.xlu0 %1213, %v1315_v10  }
  0x91   :  { %1216 = vset.pattern.permute.xlu0 %v1260_v22 }
  0x92   :  { %198 = vperm.xlu0 %1216, %v1320_v11  }
  0xf7   :  { %v56_v3 = vpop.permute.xlu0 %55 }
  0xf8   :  { %v57_v4 = vadd.f32 %v56_v3, %v54_v2 }
  0xfa   :  { %58 = vrot.lane.b32.xlu1 %v57_v4, %s1257_s20 }
 0x104   :  { %v85_v24 = vpop.permute.xlu0 %84 }
 0x108   :  { %v70_v30 = vpop.permute.xlu0 %69 }
 0x10d   :  { %v199_v50 = vpop.permute.xlu0 %198 }
 0x16c   :  { %v59_v6 = vpop.permute.xlu1 %58 }
 0x16d   :  { %v60_v8 = vadd.f32 %v59_v6, %v57_v4 }
 0x16f   :  { %61 = vrot.lane.b32.xlu1 %v60_v8, %s1259_s24 }
 0x173   :  { %79 = vperm.xlu1 %1214, %v1320_v11  }
 0x177   :  { %74 = vperm.xlu1 %1214, %v1327_v12  }
 0x17b   :  { %1215 = vset.pattern.permute.xlu1 %v1260_v22 }
 0x17c   :  { %202 = vperm.xlu1 %1215, %v1308_v7  }
 0x180   :  { %194 = vperm.xlu1 %1215, %v1327_v12  }
 0x184   :  { %190 = vperm.xlu1 %1215, %v1315_v10  }
 0x1e1   :  { %v62_v15 = vpop.permute.xlu1 %61 }
 0x1e2   :  { %v63_v16 = vadd.f32 %v62_v15, %v60_v8 }
 0x1e4   :  { %v66_v17 = vadd.f32 %v65_v14, %v63_v16 }
 0x1e6   :  { %1152 = vmatprep.subr.mxu0 %v66_v17 }
 0x1e7   :  { %1153 = vmatpush3.msra.mxu0 %v66_v17 }
 0x1e8   :  { %1155 = vmatmul.mubr.msk.f32.vlgmr.msra.gmra.mxu0 %vm87_vm0, %v32_v18 }
 0x1e9   :  { %1157 = vmatprep.mubr.msk.f32.mxu0 %vm87_vm0, %v33_v19 }
 0x1ec   :  { %1158 = vmatmul.mubr.msk.f32.gmra.mxu0 %vm87_vm0, %v34_v20 }
 0x1ee   :  { %v80_v23 = vpop.permute.xlu1 %79 }
 0x1f2   :  { %v75_v27 = vpop.permute.xlu1 %74 }
 0x1f7   :  { %v203_v42 = vpop.permute.xlu1 %202 }
 0x1fb   :  { %v195_v43 = vpop.permute.xlu1 %194 }
 0x1ff   :  { %v191_v45 = vpop.permute.xlu1 %190 }
 0x2a8   :  { %v1156_v25 = vpop.f32.mrf.mxu0 }
 0x2a9   :  { %v172_v32 = vadd.f32 %v1156_v25, %v75_v27 }
 0x2aa   :  { %v166_v26 = vpop.f32.mrf.mxu0 }
 0x2ab   :  { %v167_v35 = vadd.f32 %v166_v26, %v70_v30  ;;  %v186_v37 = vmax.f32 %v172_v32, 0.0  ;;  %v39_v30 = vld [vmem:[%s1532_s1 + $0x40] sm:$0xff] }
 0x2ac   :  { %v1159_v28 = vpop.f32.mrf.mxu0 }
 0x2ad   :  { %v182_v29 = vadd.f32 %v1159_v28, %v85_v24  ;;  %v185_v38 = vmax.f32 %v167_v35, 0.0 }
 0x2ae   :  { %v176_v31 = vpop.f32.mrf.mxu0 }
 0x2af   :  { %v188_v33 = vmax.f32 %v182_v29, 0.0  ;;  %v177_v34 = vadd.f32 %v176_v31, %v80_v23 }
 0x2b1   :  { %v187_v36 = vmax.f32 %v177_v34, 0.0  ;;  %1160 = vmatprep.subr.mxu1 %v188_v33 }
 0x2b2   :  { %1161 = vmatpush3.msra.mxu1 %v188_v33 }
 0x2b3   :  { %1162 = vmatprep.subr.mxu1 %v187_v36 }
 0x2b4   :  { %1163 = vmatpush3.msra.mxu1 %v187_v36 }
 0x2b5   :  { %1164 = vmatprep.subr.mxu1 %v186_v37 }
 0x2b6   :  { %1165 = vmatpush3.msra.mxu1 %v186_v37 }
 0x2b7   :  { %1166 = vmatprep.subr.mxu1 %v185_v38 }
 0x2b8   :  { %1167 = vmatpush3.msra.mxu1 %v185_v38  ;;  %v1261_v38 = vmov 2  }
 0x2b9   :  { %1169 = vmatmul.mubr.msk.f32.vlgmr.msra.gmra.mxu1 %vm205_vm1, %v36_v39  ;;  %1218 = vset.pattern.permute.xlu1 %v1261_v38 }
 0x2ba   :  { %1171 = vmatprep.mubr.msk.f32.mxu1 %vm205_vm1, %v37_v40  ;;  %1217 = vset.pattern.permute.xlu0 %v1261_v38 }
 0x2bd   :  { %1172 = vmatmul.mubr.msk.f32.gmra.mxu1 %vm205_vm1, %v38_v41 }
 0x2be   :  { %1182 = vmatprep.mubr.msk.f32.mxu1 %vm205_vm1, %v39_v30 }
 0x379   :  { %v1170_v44 = vpop.f32.mrf.mxu1 }
 0x37a   :  { %v290_v46 = vadd.f32 %v1170_v44, %v195_v43 }
 0x37b   :  { %v284_v47 = vpop.f32.mrf.mxu1 }
 0x37c   :  { %v285_v48 = vadd.f32 %v284_v47, %v191_v45  ;;  %v304_v52 = vmax.f32 %v290_v46, 0.0 }
 0x37d   :  { %v1173_v49 = vpop.f32.mrf.mxu1 }
 0x37e   :  { %v300_v53 = vadd.f32 %v1173_v49, %v203_v42  ;;  %v303_v55 = vmax.f32 %v285_v48, 0.0  ;;  %v308_v59 = vmul.f32 0.01, %v304_v52 }
 0x37f   :  { %v294_v54 = vpop.f32.mrf.mxu1 }
 0x380   :  { %v306_v56 = vmax.f32 %v300_v53, 0.0  ;;  %v295_v57 = vadd.f32 %v294_v54, %v199_v50  ;;  %v307_v62 = vmul.f32 0.01, %v303_v55  ;;  %v312_v2 = vmax.f32 %v304_v52, %v308_v59  ;;  %v41_v59 = vld [vmem:[%s1532_s1 + $0x50] sm:$0xff] }
 0x382   :  { %v310_v60 = vmul.f32 0.01, %v306_v56  ;;  %v305_v61 = vmax.f32 %v295_v57, 0.0  ;;  %v311_v5 = vmax.f32 %v303_v55, %v307_v62  ;;  %v319_v8 = vsel %vm317_vm2, %v312_v2, 0.0  ;;  %v40_v57 = vld [vmem:[%s1532_s1 + $0x48] sm:$0xff] }
 0x383   :  { %v1264_v62 = vmov 5  }
 0x384   :  { %v314_v63 = vmax.f32 %v306_v56, %v310_v60  ;;  %v309_v1 = vmul.f32 0.01, %v305_v61  ;;  %v1370_v9 = vsel %vm317_vm2, %v311_v5, 0.0  ;;  %v42_v60 = vld [vmem:[%s1532_s1 + $0x58] sm:$0xff] }
 0x386   :  { %v313_v3 = vmax.f32 %v305_v61, %v309_v1  ;;  %v321_v4 = vsel %vm317_vm2, %v314_v63, 0.0  ;;  %v1262_v61 = vmov 0.0  }
 0x387   :  { %328 = vrot.lane.b32.xlu0 %v321_v4, %s1255_s19  ;;  %689 = vmatprep.mubr.f32.mxu0 %v1262_v61 }
 0x388   :  { %v320_v6 = vsel %vm317_vm2, %v313_v3, 0.0 }
 0x389   :  { %326 = vrot.lane.b32.xlu1 %v320_v6, %s1255_s19 }
 0x38b   :  { %324 = vrot.lane.b32.xlu0 %v319_v8, %s1255_s19 }
 0x38d   :  { %322 = vrot.lane.b32.xlu1 %v1370_v9, %s1255_s19 }
 0x3f9   :  { %v329_v13 = vpop.permute.xlu0 %328 }
 0x3fa   :  { %v333_v14 = vadd.f32 %v329_v13, %v321_v4 }
 0x3fb   :  { %v327_v15 = vpop.permute.xlu1 %326 }
 0x3fc   :  { %v332_v16 = vadd.f32 %v327_v15, %v320_v6  ;;  %340 = vrot.lane.b32.xlu0 %v333_v14, %s1256_s2 }
 0x3fd   :  { %v325_v17 = vpop.permute.xlu0 %324 }
 0x3fe   :  { %v331_v18 = vadd.f32 %v325_v17, %v319_v8  ;;  %338 = vrot.lane.b32.xlu1 %v332_v16, %s1256_s2 }
 0x3ff   :  { %v323_v19 = vpop.permute.xlu1 %322 }
 0x400   :  { %v330_v20 = vadd.f32 %v323_v19, %v1370_v9  ;;  %336 = vrot.lane.b32.xlu0 %v331_v18, %s1256_s2 }
 0x402   :  { %334 = vrot.lane.b32.xlu1 %v330_v20, %s1256_s2  ;;  %s1086_s2 = sld [smem:[#allocation2 + $0x1]] }
 0x408   :  { %v370_v39 = vstv %s1086_s2 }
 0x409   :  { %v374_v41 = vmul.f32 %v370_v39, %v321_v4  ;;  %v373_v44 = vmul.f32 %v370_v39, %v320_v6  ;;  %v372_v48 = vmul.f32 %v370_v39, %v319_v8  ;;  %v371_v53 = vmul.f32 %v370_v39, %v1370_v9 }
 0x46e   :  { %v341_v21 = vpop.permute.xlu0 %340 }
 0x46f   :  { %v345_v22 = vadd.f32 %v341_v21, %v333_v14  ;;  %v1421_v21 = vshrl.u32 %v315_v51, 7  ;;  %v1265_v51 = vmov 1.0  }
 0x470   :  { %v339_v23 = vpop.permute.xlu1 %338 }
 0x471   :  { %v344_v24 = vadd.f32 %v339_v23, %v332_v16  ;;  %352 = vrot.lane.b32.xlu0 %v345_v22, %s1257_s20  ;;  %v577_v23 = vadd.s32 384, %v1364_v58 }
 0x472   :  { %v337_v25 = vpop.permute.xlu0 %336 }
 0x473   :  { %v343_v26 = vadd.f32 %v337_v25, %v331_v18  ;;  %350 = vrot.lane.b32.xlu1 %v344_v24, %s1257_s20  ;;  %v580_v25 = vadd.s32 8, %v1421_v21 }
 0x474   :  { %v335_v27 = vpop.permute.xlu1 %334 }
 0x475   :  { %v342_v28 = vadd.f32 %v335_v27, %v330_v20  ;;  %348 = vrot.lane.b32.xlu0 %v343_v26, %s1257_s20  ;;  %v43_v20 = vld [vmem:[%s1532_s1 + $0x60] sm:$0xff]  ;;  %v592_v27 = vand.u32 15, %v577_v23 }
 0x477   :  { %346 = vrot.lane.b32.xlu1 %v342_v28, %s1257_s20  ;;  %vm604_vm5 = vcmp.eq.s32.totalorder %v592_v27, %v580_v25  ;;  %vm600_vm9 = vcmp.eq.s32.totalorder %v592_v27, %v1421_v21 }
 0x4e3   :  { %v353_v29 = vpop.permute.xlu0 %352 }
 0x4e4   :  { %v357_v31 = vadd.f32 %v353_v29, %v345_v22  ;;  %v1424_v22 = vadd.s32 128, %v1364_v58 }
 0x4e5   :  { %v351_v32 = vpop.permute.xlu1 %350 }
 0x4e6   :  { %v356_v33 = vadd.f32 %v351_v32, %v344_v24  ;;  %364 = vrot.lane.b32.xlu0 %v357_v31, %s1259_s24  ;;  %v576_v24 = vadd.s32 256, %v1364_v58 }
 0x4e7   :  { %v349_v34 = vpop.permute.xlu0 %348 }
 0x4e8   :  { %v355_v35 = vadd.f32 %v349_v34, %v343_v26  ;;  %362 = vrot.lane.b32.xlu1 %v356_v33, %s1259_s24  ;;  %v1430_v26 = vshra.s32 %v1424_v22, 4  ;;  %v591_v29 = vand.u32 15, %v576_v24 }
 0x4e9   :  { %v347_v36 = vpop.permute.xlu1 %346 }
 0x4ea   :  { %v354_v37 = vadd.f32 %v347_v36, %v342_v28  ;;  %360 = vrot.lane.b32.xlu0 %v355_v35, %s1259_s24  ;;  %v585_v28 = vshra.s32 %v1364_v58, 4  ;;  %vm602_vm4 = vcmp.eq.s32.totalorder %v1430_v26, %v580_v25  ;;  %vm603_vm7 = vcmp.eq.s32.totalorder %v591_v29, %v580_v25 }
 0x4eb   :  { %1109 = vmatprep.subr.msk.mxu0 %vm602_vm4, %v1265_v51  ;;  %vm598_vm8 = vcmp.eq.s32.totalorder %v1430_v26, %v1421_v21  ;;  %vm599_vm11 = vcmp.eq.s32.totalorder %v591_v29, %v1421_v21  ;;  %v1266_v36 = vmov 3  }
 0x4ec   :  { %358 = vrot.lane.b32.xlu1 %v354_v37, %s1259_s24  ;;  %vm601_vm6 = vcmp.eq.s32.totalorder %v585_v28, %v580_v25  ;;  %vm597_vm10 = vcmp.eq.s32.totalorder %v585_v28, %v1421_v21 }
 0x4ed   :  { %1110 = vmatpush1.msk.msra.mxu0 %vm601_vm6, %v1265_v51 }
 0x4ee   :  { %392 = vperm.xlu0 %1217, %v1308_v7   ;;  %1111 = vmatprep.subr.msk.mxu0 %vm598_vm8, %v1265_v51 }
 0x4ef   :  { %1112 = vmatpush1.msk.msra.mxu0 %vm597_vm10, %v1265_v51 }
 0x4f0   :  { %388 = vperm.xlu1 %1218, %v1320_v11  }
 0x4f2   :  { %380 = vperm.xlu0 %1217, %v1315_v10  }
 0x4f4   :  { %384 = vperm.xlu1 %1218, %v1327_v12  }
 0x4f6   :  { %1220 = vset.pattern.permute.xlu0 %v1266_v36 }
 0x4f7   :  { %770 = vperm.xlu0 %1220, %v1315_v10  }
 0x4f8   :  { %1219 = vset.pattern.permute.xlu1 %v1264_v62 }
 0x4f9   :  { %497 = vperm.xlu1 %1219, %v1315_v10  }
 0x4fb   :  { %782 = vperm.xlu0 %1220, %v1308_v7  }
 0x4fd   :  { %1221 = vset.pattern.permute.xlu1 %v1266_v36 }
 0x4fe   :  { %774 = vperm.xlu1 %1221, %v1327_v12  }
 0x502   :  { %778 = vperm.xlu1 %1221, %v1320_v11  }
 0x558   :  { %v365_v40 = vpop.permute.xlu0 %364 }
 0x559   :  { %v369_v42 = vadd.f32 %v365_v40, %v357_v31 }
 0x55a   :  { %v363_v43 = vpop.permute.xlu1 %362 }
 0x55b   :  { %v378_v45 = vadd.f32 %v374_v41, %v369_v42  ;;  %v368_v46 = vadd.f32 %v363_v43, %v356_v33  ;;  %v44_v42 = vld [vmem:[%s1532_s1 + $0x68] sm:$0xff]  ;;  %v45_v43 = vld [vmem:[%s1532_s1 + $0x70] sm:$0xff] }
 0x55c   :  { %v361_v47 = vpop.permute.xlu0 %360 }
 0x55d   :  { %v377_v49 = vadd.f32 %v373_v44, %v368_v46  ;;  %v367_v50 = vadd.f32 %v361_v47, %v355_v35  ;;  %1174 = vmatprep.subr.mxu1 %v378_v45  ;;  %v46_v44 = vld [vmem:[%s1532_s1 + $0x78] sm:$0xff]  ;;  %v589_v47 = vand.u32 15, %v1364_v58 }
 0x55e   :  { %1175 = vmatpush3.msra.mxu1 %v378_v45  ;;  %v359_v52 = vpop.permute.xlu1 %358  ;;  %v47_v45 = vld [vmem:[%s1532_s1 + $0x80] sm:$0xff]  ;;  %s1087_s1 = sld [smem:[#allocation2 + $0x2]] }
 0x55f   :  { %v376_v54 = vadd.f32 %v372_v48, %v367_v50  ;;  %v366_v55 = vadd.f32 %v359_v52, %v354_v37  ;;  %1176 = vmatprep.subr.mxu1 %v377_v49  ;;  %v590_v48 = vand.u32 15, %v1424_v22  ;;  %vm902_vm13 = vcmp.ne.s32.totalorder %v585_v28, %v589_v47 }
 0x560   :  { %1177 = vmatpush3.msra.mxu1 %v377_v49  ;;  %v1470_v62 = vsel %vm902_vm13, 1.0, %v1262_v61 }
 0x561   :  { %v375_v56 = vadd.f32 %v371_v53, %v366_v55  ;;  %1178 = vmatprep.subr.mxu1 %v376_v54  ;;  %vm903_vm14 = vcmp.ne.s32.totalorder %v1430_v26, %v590_v48 }
 0x562   :  { %1179 = vmatpush3.msra.mxu1 %v376_v54 }
 0x563   :  { %1180 = vmatprep.subr.mxu1 %v375_v56 }
 0x564   :  { %1181 = vmatpush3.msra.mxu1 %v375_v56 }
 0x565   :  { %1183 = vmatmul.mubr.msk.f32.vlgmr.msra.gmra.mxu1 %vm205_vm1, %v40_v57  ;;  %1188 = vmatprep.subr.mxu1 %v1262_v61 }
 0x566   :  { %1185 = vmatprep.mubr.msk.f32.mxu1 %vm205_vm1, %v41_v59 }
 0x569   :  { %1186 = vmatmul.mubr.msk.f32.gmra.mxu1 %vm205_vm1, %v42_v60  ;;  %v393_v1 = vpop.permute.xlu0 %392 }
 0x56a   :  { %1196 = vmatprep.mubr.msk.f32.mxu1 %vm1263_vm3, %v1262_v61 }
 0x56b   :  { %v389_v63 = vpop.permute.xlu1 %388 }
 0x56d   :  { %v381_v8 = vpop.permute.xlu0 %380 }
 0x56f   :  { %v385_v4 = vpop.permute.xlu1 %384 }
 0x572   :  { %v771_v46 = vpop.permute.xlu0 %770 }
 0x574   :  { %v498_v30 = vpop.permute.xlu1 %497 }
 0x579   :  { %v775_v53 = vpop.permute.xlu1 %774 }
 0x625   :  { %v1184_v2 = vpop.f32.mrf.mxu1 }
 0x626   :  { %v479_v13 = vadd.f32 %v1184_v2, %v385_v4  ;;  %v779_v4 = vpop.permute.xlu1 %778 }
 0x627   :  { %v473_v3 = vpop.f32.mrf.mxu1 }
 0x628   :  { %v474_v16 = vadd.f32 %v473_v3, %v381_v8  ;;  %v493_v18 = vmax.f32 %v479_v13, 0.0 }
 0x629   :  { %v1187_v5 = vpop.f32.mrf.mxu1 }
 0x62a   :  { %v489_v6 = vadd.f32 %v1187_v5, %v393_v1  ;;  %v492_v19 = vmax.f32 %v474_v16, 0.0 }
 0x62b   :  { %v483_v9 = vpop.f32.mrf.mxu1 }
 0x62c   :  { %v495_v14 = vmax.f32 %v489_v6, 0.0  ;;  %v484_v15 = vadd.f32 %v483_v9, %v389_v63  ;;  %v1473_v63 = vsel %vm903_vm14, 1.0, %v1262_v61 }
 0x62e   :  { %v494_v17 = vmax.f32 %v484_v15, 0.0  ;;  %1189 = vmatpush3.msra.mxu1 %v495_v14 }
 0x62f   :  { %1190 = vmatprep.subr.mxu1 %v1262_v61 }
 0x630   :  { %1191 = vmatpush3.msra.mxu1 %v494_v17 }
 0x631   :  { %1192 = vmatprep.subr.mxu1 %v1262_v61 }
 0x632   :  { %1193 = vmatpush3.msra.mxu1 %v493_v18 }
 0x633   :  { %1194 = vmatprep.subr.mxu1 %v1262_v61 }
 0x634   :  { %1195 = vmatpush3.msra.mxu1 %v492_v19  ;;  %v783_v19 = vpop.permute.xlu0 %782 }
 0x635   :  { %1197 = vmatmul.mubr.msk.f32.vlgmr.msra.gmra.mxu1 %vm205_vm1, %v43_v20  ;;  %1114 = vmatprep.subr.msk.mxu1 %vm604_vm5, %v1265_v51 }
 0x636   :  { %760 = vmatprep.mubr.f32.mxu1 %v1262_v61  ;;  %1115 = vmatpush1.msk.msra.mxu1 %vm603_vm7, %v1265_v51 }
 0x637   :  { %1116 = vmatprep.subr.msk.mxu1 %vm600_vm9, %v1265_v51 }
 0x638   :  { %1117 = vmatpush1.msk.msra.mxu1 %vm599_vm11, %v1265_v51 }
 0x6f5   :  { %v569_v31 = vpop.f32.mrf.mxu1 }
 0x6f6   :  { %v570_v32 = vadd.f32 %v569_v31, %v498_v30 }
 0x6f7   :  { %v1198_v33 = vpop.f32.mrf.mxu1 }
 0x6f8   :  { %v573_v34 = vmax.f32 %v570_v32, 0.0 }
 0x6fa   :  { %v574_v35 = vadd.f32 %v573_v34, %v1294_v0 }
 0x6fc   :  { %1113 = vmatmul.mubr.msk.f32.vlgmr.msra.gmra.mxu0 %vm621_vm12, %v574_v35  ;;  %1118 = vmatmul.mubr.msk.f32.vlgmr.msra.gmra.mxu1 %vm621_vm12, %v574_v35 }
 0x6fd   :  { %861 = vmatprep.mubr.f32.mxu0 %v1262_v61 }
 0x7bc   :  { %v691_v37 = vpop.f32.mrf.mxu0  ;;  %v762_v38 = vpop.f32.mrf.mxu1 }
 0x7bd   :  { %v767_v41 = vmul.f32 %v762_v38, %v691_v37 }
 0x7be   :  { %v693_v39 = vpop.f32.mrf.mxu0  ;;  %v764_v40 = vpop.f32.mrf.mxu1 }
 0x7bf   :  { %v768_v0 = vmul.f32 %v764_v40, %v693_v39 }
 0x7c1   :  { %827 = vmatprep.subr.mxu0 %v768_v0 }
 0x7c2   :  { %828 = vmatpush1.msra.mxu0 %v767_v41 }
 0x7c3   :  { %1119 = vmatmul.mubr.msk.f32.vlgmr.msra.gmra.mxu0 %vm87_vm0, %v44_v42 }
 0x7c4   :  { %867 = vmatprep.mubr.f32.mxu0 %v1262_v61 }
 0x7c7   :  { %1120 = vmatmul.mubr.msk.f32.gmra.mxu0 %vm87_vm0, %v45_v43 }
 0x7c8   :  { %873 = vmatprep.mubr.f32.mxu0 %v1262_v61 }
 0x7cb   :  { %1121 = vmatmul.mubr.msk.f32.gmra.mxu0 %vm87_vm0, %v46_v44 }
 0x7cc   :  { %879 = vmatprep.mubr.f32.mxu0 %v1262_v61 }
 0x7cf   :  { %1122 = vmatmul.mubr.msk.f32.gmra.mxu0 %vm87_vm0, %v47_v45  ;;  %vm1050_vm0 = vcmp.eq.s32.totalorder %v1421_v21, 0 }
 0x883   :  { %v863_v49 = vpop.f32.mrf.mxu0 }
 0x884   :  { %v864_v50 = vadd.f32 %v863_v49, %v771_v46 }
 0x885   :  { %v865_v52 = vpop.f32.mrf.mxu0 }
 0x886   :  { %v886_v54 = vmul.f32 0.01, %v864_v50  ;;  %v866_v55 = vadd.f32 %v865_v52, %v771_v46  ;;  %v1267_v52 = vmov 4  }
 0x887   :  { %v869_v56 = vpop.f32.mrf.mxu0  ;;  %1222 = vset.pattern.permute.xlu0 %v1267_v52  ;;  %1223 = vset.pattern.permute.xlu1 %v1267_v52 }
 0x888   :  { %v1467_v57 = vmax.f32 %v864_v50, %v886_v54  ;;  %v887_v59 = vmul.f32 0.01, %v866_v55  ;;  %v870_v60 = vadd.f32 %v869_v56, %v775_v53 }
 0x889   :  { %v871_v58 = vpop.f32.mrf.mxu0 }
 0x88a   :  { %v1475_v1 = vmax.f32 %v866_v55, %v887_v59  ;;  %v888_v2 = vmul.f32 0.01, %v870_v60  ;;  %v872_v3 = vadd.f32 %v871_v58, %v775_v53  ;;  %v908_v6 = vmul.f32 %v1470_v62, %v1467_v57 }
 0x88b   :  { %v875_v5 = vpop.f32.mrf.mxu0 }
 0x88c   :  { %v1479_v8 = vmax.f32 %v870_v60, %v888_v2  ;;  %v889_v9 = vmul.f32 0.01, %v872_v3  ;;  %v876_v13 = vadd.f32 %v875_v5, %v779_v4  ;;  %v909_v14 = vmul.f32 %v1473_v63, %v1475_v1 }
 0x88d   :  { %v877_v15 = vpop.f32.mrf.mxu0  ;;  %v932_v22 = vmul.f32 %v908_v6, %v1467_v57 }
 0x88e   :  { %v1483_v16 = vmax.f32 %v872_v3, %v889_v9  ;;  %v878_v61 = vadd.f32 %v877_v15, %v779_v4  ;;  %v916_v17 = vadd.f32 %v909_v14, %v908_v6  ;;  %v890_v18 = vmul.f32 0.01, %v876_v13 }
 0x88f   :  { %v881_v20 = vpop.f32.mrf.mxu0  ;;  %v933_v23 = vmul.f32 %v909_v14, %v1475_v1  ;;  %v910_v26 = vmul.f32 %v1470_v62, %v1479_v8 }
 0x890   :  { %v891_v24 = vmul.f32 0.01, %v878_v61  ;;  %v882_v25 = vadd.f32 %v881_v20, %v783_v19  ;;  %917 = vadd.xlane.f32.xlu1 %v916_v17  ;;  %v911_v27 = vmul.f32 %v1473_v63, %v1483_v16  ;;  %v1494_v34 = vmax.f32 %v876_v13, %v890_v18 }
 0x891   :  { %v883_v28 = vpop.f32.mrf.mxu0  ;;  %v940_v29 = vadd.f32 %v933_v23, %v932_v22  ;;  %v934_v37 = vmul.f32 %v910_v26, %v1479_v8 }
 0x892   :  { %v1491_v51 = vmax.f32 %v878_v61, %v891_v24  ;;  %v892_v30 = vmul.f32 0.01, %v882_v25  ;;  %v884_v31 = vadd.f32 %v883_v28, %v783_v19  ;;  %v919_v32 = vadd.f32 %v911_v27, %v910_v26 }
 0x893   :  { %v935_v33 = vmul.f32 %v911_v27, %v1483_v16  ;;  %v912_v0 = vmul.f32 %v1470_v62, %v1494_v34 }
 0x894   :  { %v1496_v35 = vmax.f32 %v882_v25, %v892_v30  ;;  %v893_v36 = vmul.f32 0.01, %v884_v31  ;;  %920 = vadd.xlane.f32.xlu0 %v919_v32  ;;  %941 = vadd.xlane.f32.xlu1 %v940_v29  ;;  %v913_v40 = vmul.f32 %v1473_v63, %v1491_v51 }
 0x895   :  { %v943_v39 = vadd.f32 %v935_v33, %v934_v37  ;;  %v936_v47 = vmul.f32 %v912_v0, %v1494_v34 }
 0x896   :  { %v1499_v38 = vmax.f32 %v884_v31, %v893_v36  ;;  %v914_v41 = vmul.f32 %v1470_v62, %v1496_v35  ;;  %v922_v43 = vadd.f32 %v913_v40, %v912_v0  ;;  %v937_v45 = vmul.f32 %v913_v40, %v1491_v51 }
 0x898   :  { %944 = vadd.xlane.f32.xlu0 %v943_v39  ;;  %v915_v42 = vmul.f32 %v1473_v63, %v1499_v38  ;;  %v938_v48 = vmul.f32 %v914_v41, %v1496_v35  ;;  %v946_v49 = vadd.f32 %v937_v45, %v936_v47 }
 0x89a   :  { %v925_v44 = vadd.f32 %v915_v42, %v914_v41  ;;  %v939_v46 = vmul.f32 %v915_v42, %v1499_v38 }
 0x89c   :  { %923 = vadd.xlane.f32.xlu0 %v922_v43  ;;  %926 = vadd.xlane.f32.xlu1 %v925_v44  ;;  %v949_v50 = vadd.f32 %v939_v46, %v938_v48 }
 0x8a0   :  { %947 = vadd.xlane.f32.xlu0 %v946_v49  ;;  %950 = vadd.xlane.f32.xlu1 %v949_v50 }
 0x919   :  { %v918_v53 = vpop.xlane.xlu1 %917 }
 0x91a   :  { %v928_v54 = vmul.f32 0.004166667, %v918_v53 }
 0x91c   :  { %v956_v59 = vmul.f32 %v928_v54, %v928_v54 }
 0x91d   :  { %v921_v55 = vpop.xlane.xlu0 %920  ;;  %v942_v56 = vpop.xlane.xlu1 %941 }
 0x91e   :  { %v929_v60 = vmul.f32 0.004166667, %v921_v55  ;;  %v952_v58 = vmul.f32 0.004166667, %v942_v56 }
 0x920   :  { %v960_v2 = vsub.f32 %v952_v58, %v956_v59  ;;  %v957_v4 = vmul.f32 %v929_v60, %v929_v60 }
 0x921   :  { %v945_v3 = vpop.xlane.xlu0 %944 }
 0x922   :  { %v964_v5 = vadd.f32 1e-05, %v960_v2  ;;  %v953_v6 = vmul.f32 0.004166667, %v945_v3 }
 0x924   :  { %1224 = vrsqrt.f32 %v964_v5  ;;  %v961_v9 = vsub.f32 %v953_v6, %v957_v4 }
 0x925   :  { %v924_v13 = vpop.xlane.xlu0 %923  ;;  %v927_v14 = vpop.xlane.xlu1 %926 }
 0x926   :  { %v965_v15 = vadd.f32 1e-05, %v961_v9  ;;  %v930_v61 = vmul.f32 0.004166667, %v924_v13  ;;  %v931_v17 = vmul.f32 0.004166667, %v927_v14 }
 0x928   :  { %1226 = vrsqrt.f32 %v965_v15  ;;  %v958_v20 = vmul.f32 %v930_v61, %v930_v61  ;;  %v959_v22 = vmul.f32 %v931_v17, %v931_v17 }
 0x929   :  { %v948_v18 = vpop.xlane.xlu0 %947  ;;  %v951_v19 = vpop.xlane.xlu1 %950 }
 0x92a   :  { %v954_v23 = vmul.f32 0.004166667, %v948_v18  ;;  %v955_v24 = vmul.f32 0.004166667, %v951_v19 }
 0x92c   :  { %v962_v25 = vsub.f32 %v954_v23, %v958_v20  ;;  %v963_v26 = vsub.f32 %v955_v24, %v959_v22 }
 0x92e   :  { %v966_v27 = vadd.f32 1e-05, %v962_v25  ;;  %v967_v28 = vadd.f32 1e-05, %v963_v26  ;;  %v1047_v26 = vstv %s1087_s1 }
 0x930   :  { %1228 = vrsqrt.f32 %v966_v27 }
 0x931   :  { %v1225_v29 = vpop.eup %1224  ;;  %1230 = vrsqrt.f32 %v967_v28 }
 0x932   :  { %v972_v30 = vmul.f32 %v1225_v29, %v1315_v10 }
 0x934   :  { %978 = vperm.xlu0 %1222, %v972_v30   ;;  %v1022_v36 = vmul.f32 %v972_v30, %v928_v54 }
 0x935   :  { %v1227_v31 = vpop.eup %1226 }
 0x936   :  { %v973_v32 = vmul.f32 %v1227_v31, %v1327_v12  ;;  %v1027_v42 = vsel %vm1026_vm15, %v1022_v36, 0.0 }
 0x938   :  { %983 = vperm.xlu1 %1223, %v973_v32   ;;  %v1023_v33 = vmul.f32 %v973_v32, %v929_v60 }
 0x93a   :  { %v1028_v40 = vsel %vm1026_vm15, %v1023_v33, 0.0 }
 0x93b   :  { %v1029_v44 = vadd.f32 %v1028_v40, %v1027_v42 }
 0x93d   :  { %v1229_v37 = vpop.eup %1228 }
 0x93e   :  { %v1231_v39 = vpop.eup %1230  ;;  %v974_v0 = vmul.f32 %v1229_v37, %v1320_v11 }
 0x93f   :  { %v975_v41 = vmul.f32 %v1231_v39, %v1308_v7 }
 0x940   :  { %v1024_v43 = vmul.f32 %v974_v0, %v930_v61  ;;  %988 = vperm.xlu1 %1223, %v974_v0  }
 0x941   :  { %v1025_v10 = vmul.f32 %v975_v41, %v931_v17 }
 0x942   :  { %v1030_v45 = vsel %vm1026_vm15, %v1024_v43, 0.0 }
 0x943   :  { %v1031_v46 = vadd.f32 %v1030_v45, %v1029_v44  ;;  %v1032_v12 = vsel %vm1026_vm15, %v1025_v10, 0.0 }
 0x944   :  { %993 = vperm.xlu1 %1223, %v975_v41  }
 0x945   :  { %v1033_v47 = vadd.f32 %v1032_v12, %v1031_v46 }
 0x947   :  { %v1034_v48 = vrot.slane %v1033_v47, 4 }
 0x949   :  { %v1035_v49 = vadd.f32 %v1034_v48, %v1033_v47 }
 0x94b   :  { %v1036_v50 = vrot.slane %v1035_v49, 2 }
 0x94d   :  { %v1037_v52 = vadd.f32 %v1036_v50, %v1035_v49 }
 0x94f   :  { %v1038_v53 = vrot.slane %v1037_v52, 1 }
 0x951   :  { %v1039_v54 = vadd.f32 %v1038_v53, %v1037_v52 }
 0x953   :  { %1042 = vperm.xlu1 %1223, %v1039_v54  }
 0x9af   :  { %v979_v55 = vpop.permute.xlu0 %978 }
 0x9b0   :  { %v996_v60 = vmul.f32 %v979_v55, %v1467_v57  ;;  %v997_v58 = vmul.f32 %v979_v55, %v1475_v1 }
 0x9b3   :  { %v984_v11 = vpop.permute.xlu1 %983 }
 0x9b4   :  { %v998_v7 = vmul.f32 %v984_v11, %v1479_v8  ;;  %v999_v56 = vmul.f32 %v984_v11, %v1483_v16 }
 0x9b6   :  { %v1004_v4 = vadd.f32 %v998_v7, %v996_v60  ;;  %v1013_v5 = vadd.f32 %v999_v56, %v997_v58 }
 0x9bb   :  { %v989_v59 = vpop.permute.xlu1 %988 }
 0x9bc   :  { %v1000_v2 = vmul.f32 %v989_v59, %v1494_v34  ;;  %v1001_v3 = vmul.f32 %v989_v59, %v1491_v51 }
 0x9be   :  { %v1005_v9 = vadd.f32 %v1004_v4, %v1000_v2  ;;  %v1014_v13 = vadd.f32 %v1013_v5, %v1001_v3 }
 0x9bf   :  { %v994_v6 = vpop.permute.xlu1 %993 }
 0x9c0   :  { %v1002_v14 = vmul.f32 %v994_v6, %v1496_v35  ;;  %v1003_v8 = vmul.f32 %v994_v6, %v1499_v38 }
 0x9c2   :  { %v1006_v15 = vadd.f32 %v1005_v9, %v1002_v14  ;;  %v1015_v16 = vadd.f32 %v1014_v13, %v1003_v8 }
 0x9c4   :  { %v1007_v61 = vrot.slane %v1006_v15, 4  ;;  %v1016_v17 = vrot.slane %v1015_v16, 4 }
 0x9c6   :  { %v1008_v57 = vadd.f32 %v1007_v61, %v1006_v15  ;;  %v1017_v18 = vadd.f32 %v1016_v17, %v1015_v16 }
 0x9c8   :  { %v1009_v1 = vrot.slane %v1008_v57, 2  ;;  %v1018_v34 = vrot.slane %v1017_v18, 2 }
 0x9ca   :  { %v1010_v19 = vadd.f32 %v1009_v1, %v1008_v57  ;;  %v1019_v51 = vadd.f32 %v1018_v34, %v1017_v18 }
 0x9cc   :  { %v1011_v20 = vrot.slane %v1010_v19, 1  ;;  %v1020_v22 = vrot.slane %v1019_v51, 1 }
 0x9ce   :  { %v1012_v23 = vadd.f32 %v1011_v20, %v1010_v19  ;;  %v1021_v24 = vadd.f32 %v1020_v22, %v1019_v51  ;;  %v1043_v25 = vpop.permute.xlu1 %1042 }
 0x9d0   :  { %v1045_v35 = vsub.f32 %v1012_v23, %v1043_v25  ;;  %v1046_v27 = vsub.f32 %v1021_v24, %v1043_v25 }
 0x9d2   :  { %v1048_v38 = vadd.f32 %v1047_v26, %v1045_v35  ;;  %v1049_v28 = vadd.f32 %v1047_v26, %v1046_v27 }
 0x9d4   :  { %v1051_v29 = vsub.f32 0.0, %v1048_v38  ;;  %v1052_v30 = vsub.f32 0.0, %v1049_v28 }
 0x9d6   :  { %v1053_v31 = vsel %vm1050_vm0, %v1051_v29, %v1048_v38  ;;  %v1054_v32 = vsel %vm1050_vm0, %v1052_v30, %v1049_v28 }
 0x9d7   :  { %v1055_v33 = vsub.f32 0.0, %v1053_v31  ;;  %v1056_v36 = vsub.f32 0.0, %v1054_v32 }
 0x9d9   :  { %v1057_v37 = vmul.f32 1.442695, %v1055_v33  ;;  %v1059_v39 = vmul.f32 1.442695, %v1056_v36 }
 0x9db   :  { %1232 = vpow2.f32 %v1057_v37 }
 0x9dc   :  { %1234 = vpow2.f32 %v1059_v39 }
 0x9e8   :  { %v1233_v40 = vpop.eup %1232 }
 0x9e9   :  { %v1235_v0 = vpop.eup %1234  ;;  %v1061_v41 = vadd.f32 1.0, %v1233_v40 }
 0x9ea   :  { %v1062_v42 = vadd.f32 1.0, %v1235_v0 }
 0x9eb   :  { %1236 = vrcp.f32 %v1061_v41 }
 0x9ec   :  { %1238 = vrcp.f32 %v1062_v42 }
 0x9f8   :  { %v1237_v43 = vpop.eup %1236 }
 0x9f9   :  { %v1239_v44 = vpop.eup %1238  ;;  %v1067_v21 = vmul.f32 %v1237_v43, %v1470_v62 }
 0x9fa   :  { %v1068_v10 = vmul.f32 %v1239_v44, %v1473_v63 }
 0x9fc   :  { %v1071_v45 = vcombine.low %v1067_v21, %v1068_v10 }
 0x9fe   :  { %1125 = vst.sshfl [vmem:[%s1534_s3] sm:$0x33 pattern:$0x76325410] %v1071_v45 }
 0x9ff   :  { %1085 = vsyncpa [#allocation3], 1 }

</bundles_post_ra>
